<compile_context>
chip_gen: v6e
topology: v6e:2x2x1
jax: 0.10.0
libtpu: 0.0.40
codegen_flags: <defaults>
</compile_context>

<pallas_src>
import jax
import jax.numpy as jnp
from jax.experimental import pallas as pl
from jax.experimental.pallas import tpu as pltpu

LANE = 128


def _round_up(x, m):
    return ((x + m - 1) // m) * m


def actor_kernel(x_ref, w1_ref, b1_ref, w2_ref, b2_ref, o_ref):
    # x: (TB, In) f32 | w1: (In, Hp) bf16 | b1: (1, Hp) f32
    # w2: (Hp, Op) bf16 | b2: (1, Op) f32 | o: (TB, Op) f32
    x = x_ref[...].astype(jnp.bfloat16)
    h = jnp.dot(x, w1_ref[...], preferred_element_type=jnp.float32)   # (TB, Hp) f32 acc
    h = jnp.maximum(h + b1_ref[...], 0.0)                             # bias + ReLU in f32
    y = jnp.dot(h.astype(jnp.bfloat16), w2_ref[...],
                preferred_element_type=jnp.float32)                   # (TB, Op) f32 acc
    y = y + b2_ref[...]
    o_ref[...] = jax.nn.sigmoid(y).astype(o_ref.dtype)                # sigmoid on EUP, f32


def actor_forward(state, w1p, b1p, w2p, b2p, output_size, *, max_block_b=256):
    """state: (B, In) f32.
    w1p: (In, Hp) bf16, b1p: (1, Hp) f32, w2p: (Hp, Op) bf16, b2p: (1, Op) f32
    (Hp, Op are lane-padded).  Returns (B, output_size) f32."""
    B, in_size = state.shape
    hp = w1p.shape[1]
    op = w2p.shape[1]

    # Batch tile: multiple of 8 sublanes, capped so VMEM stays tiny even with
    # double buffering (256 x 128 x 4B per buffer << scoped VMEM limits).
    tb = min(max_block_b, _round_up(B, 8))
    b_pad = _round_up(B, tb)
    if b_pad != B:
        state = jnp.pad(state, ((0, b_pad - B), (0, 0)))
    grid = (b_pad // tb,)

    flops = 2 * b_pad * (in_size * hp + hp * op)
    bytes_accessed = (state.size * 4 + w1p.size * 2 + w2p.size * 2
                      + b1p.size * 4 + b2p.size * 4 + b_pad * op * 4)

    out = pl.pallas_call(
        actor_kernel,
        out_shape=jax.ShapeDtypeStruct((b_pad, op), jnp.float32),
        grid=grid,
        in_specs=[
            pl.BlockSpec((tb, in_size), lambda i: (i, 0)),   # state: tiled over batch
            pl.BlockSpec((in_size, hp), lambda i: (0, 0)),   # w1: resident
            pl.BlockSpec((1, hp), lambda i: (0, 0)),         # b1: resident
            pl.BlockSpec((hp, op), lambda i: (0, 0)),        # w2: resident
            pl.BlockSpec((1, op), lambda i: (0, 0)),         # b2: resident
        ],
        out_specs=pl.BlockSpec((tb, op), lambda i: (i, 0)),
        compiler_params=pltpu.CompilerParams(
            dimension_semantics=("parallel",),               # megacore split on v7x
        ),
        cost_estimate=pl.CostEstimate(
            flops=flops, transcendentals=b_pad * op, bytes_accessed=bytes_accessed),
    )(state, w1p, b1p, w2p, b2p)

    return out[:B, :output_size]


def init_actor_params(key, input_size, hidden_size, output_size):
    """PyTorch nn.Linear default init, then lane-pad H and O to 128."""
    k1w, k1b, k2w, k2b = jax.random.split(key, 4)
    bound1 = 1.0 / (input_size ** 0.5)
    w1 = jax.random.uniform(k1w, (input_size, hidden_size), jnp.float32, -bound1, bound1)
    b1 = jax.random.uniform(k1b, (hidden_size,), jnp.float32, -bound1, bound1)
    bound2 = 1.0 / (hidden_size ** 0.5)
    w2 = jax.random.uniform(k2w, (hidden_size, output_size), jnp.float32, -bound2, bound2)
    b2 = jax.random.uniform(k2b, (output_size,), jnp.float32, -bound2, bound2)

    hp = _round_up(hidden_size, LANE)
    op = _round_up(output_size, LANE)
    w1p = jnp.zeros((input_size, hp), jnp.float32).at[:, :hidden_size].set(w1)
    b1p = jnp.zeros((1, hp), jnp.float32).at[:, :hidden_size].set(b1)
    w2p = jnp.zeros((hp, op), jnp.float32).at[:hidden_size, :output_size].set(w2)
    b2p = jnp.zeros((1, op), jnp.float32).at[:, :output_size].set(b2)

    raw = (w1, b1, w2, b2)
    padded = (w1p.astype(jnp.bfloat16), b1p, w2p.astype(jnp.bfloat16), b2p)
    return raw, padded


def reference_forward_f32(state, w1, b1, w2, b2):
    h = jnp.maximum(state @ w1 + b1, 0.0)
    return jax.nn.sigmoid(h @ w2 + b2)


def reference_forward_bf16(state, w1p, b1p, w2p, b2p, output_size):
    h = jnp.dot(state.astype(jnp.bfloat16), w1p, preferred_element_type=jnp.float32)
    h = jnp.maximum(h + b1p, 0.0)
    y = jnp.dot(h.astype(jnp.bfloat16), w2p, preferred_element_type=jnp.float32)
    return jax.nn.sigmoid(y + b2p)[:, :output_size]


if __name__ == "__main__":
    # Small shapes consistent with the module: batch=2, input=16, hidden=32, output=8
    B, INPUT, HIDDEN, OUTPUT = 2, 16, 32, 8

    key = jax.random.PRNGKey(0)
    k_state, k_params, k_big = jax.random.split(key, 3)

    state = jax.random.normal(k_state, (B, INPUT), jnp.float32)
    (w1, b1, w2, b2), (w1p, b1p, w2p, b2p) = init_actor_params(
        k_params, INPUT, HIDDEN, OUTPUT)

    out = actor_forward(state, w1p, b1p, w2p, b2p, OUTPUT)
    out = jax.block_until_ready(out)
    assert out.shape == (B, OUTPUT)

    # Semantics check vs. the f32 PyTorch-equivalent reference (bf16 matmul tolerance).
    ref_f32 = reference_forward_f32(state, w1, b1, w2, b2)
    assert jnp.allclose(out, ref_f32, atol=2e-2, rtol=2e-2)
    # Tight check vs. the same-precision (bf16 matmul, f32 acc) reference.
    ref_bf16 = reference_forward_bf16(state, w1p, b1p, w2p, b2p, OUTPUT)
    assert jnp.allclose(out, ref_bf16, atol=2e-3, rtol=2e-3)

    # Exercise the multi-tile grid + batch-padding path (B not a tile multiple).
    big_state = jax.random.normal(k_big, (300, INPUT), jnp.float32)
    big_out = jax.block_until_ready(
        actor_forward(big_state, w1p, b1p, w2p, b2p, OUTPUT))
    big_ref = reference_forward_f32(big_state, w1, b1, w2, b2)
    assert big_out.shape == (300, OUTPUT)
    assert jnp.allclose(big_out, big_ref, atol=2e-2, rtol=2e-2)

    print("KERNEL_OK")
</pallas_src>

<mosaic_0001>
module attributes {stable_mosaic.version = 11 : i64} {
  func.func @actor_kernel(%arg0: i32, %arg1: memref<8x16xf32, #tpu.memory_space<vmem>>, %arg2: memref<16x128xbf16, #tpu.memory_space<vmem>>, %arg3: memref<1x128xf32, #tpu.memory_space<vmem>>, %arg4: memref<128x128xbf16, #tpu.memory_space<vmem>>, %arg5: memref<1x128xf32, #tpu.memory_space<vmem>>, %arg6: memref<8x128xf32, #tpu.memory_space<vmem>>) attributes {dimension_semantics = [#tpu.dimension_semantics<parallel>], iteration_bounds = array<i64: 1>, scalar_prefetch = 0 : i64, scratch_operands = 0 : i64, tpu.core_type = #tpu.core_type<tc>, window_params = [{transform_indices = @transform_0, window_bounds = array<i64: 8, 16>}, {pipeline_mode = #tpu.pipeline_mode<synchronous>, transform_indices = @transform_1, window_bounds = array<i64: 16, 128>}, {pipeline_mode = #tpu.pipeline_mode<synchronous>, transform_indices = @transform_2, window_bounds = array<i64: 1, 128>}, {pipeline_mode = #tpu.pipeline_mode<synchronous>, transform_indices = @transform_3, window_bounds = array<i64: 128, 128>}, {pipeline_mode = #tpu.pipeline_mode<synchronous>, transform_indices = @transform_4, window_bounds = array<i64: 1, 128>}, {transform_indices = @transform_5, window_bounds = array<i64: 8, 128>}]} {
    %c0 = arith.constant 0 : index
    %c0_0 = arith.constant 0 : index
    %0 = vector.load %arg1[%c0, %c0_0] : memref<8x16xf32, #tpu.memory_space<vmem>>, vector<8x16xf32>
    %1 = arith.truncf %0 : vector<8x16xf32> to vector<8x16xbf16>
    %c0_1 = arith.constant 0 : index
    %c0_2 = arith.constant 0 : index
    %2 = vector.load %arg2[%c0_1, %c0_2] : memref<16x128xbf16, #tpu.memory_space<vmem>>, vector<16x128xbf16>
    %cst = arith.constant dense<0.000000e+00> : vector<8x128xf32>
    %3 = tpu.matmul %1, %2, %cst {dimension_numbers = #tpu.dot_dimension_numbers<[1], [0], [0], [1], [0, 0, 1, 1], [], []>} : vector<8x16xbf16>, vector<16x128xbf16>, vector<8x128xf32> -> vector<8x128xf32>
    %c0_3 = arith.constant 0 : index
    %c0_4 = arith.constant 0 : index
    %4 = vector.load %arg3[%c0_3, %c0_4] : memref<1x128xf32, #tpu.memory_space<vmem>>, vector<1x128xf32>
    %5 = vector.broadcast %4 : vector<1x128xf32> to vector<8x128xf32>
    %6 = arith.addf %3, %5 : vector<8x128xf32>
    %cst_5 = arith.constant 0.000000e+00 : f32
    %7 = vector.broadcast %cst_5 : f32 to vector<8x128xf32>
    %8 = arith.maximumf %6, %7 : vector<8x128xf32>
    %9 = arith.truncf %8 : vector<8x128xf32> to vector<8x128xbf16>
    %c0_6 = arith.constant 0 : index
    %c0_7 = arith.constant 0 : index
    %10 = vector.load %arg4[%c0_6, %c0_7] : memref<128x128xbf16, #tpu.memory_space<vmem>>, vector<128x128xbf16>
    %cst_8 = arith.constant dense<0.000000e+00> : vector<8x128xf32>
    %11 = tpu.matmul %9, %10, %cst_8 {dimension_numbers = #tpu.dot_dimension_numbers<[1], [0], [0], [1], [0, 0, 1, 1], [], []>} : vector<8x128xbf16>, vector<128x128xbf16>, vector<8x128xf32> -> vector<8x128xf32>
    %c0_9 = arith.constant 0 : index
    %c0_10 = arith.constant 0 : index
    %12 = vector.load %arg5[%c0_9, %c0_10] : memref<1x128xf32, #tpu.memory_space<vmem>>, vector<1x128xf32>
    %13 = vector.broadcast %12 : vector<1x128xf32> to vector<8x128xf32>
    %14 = arith.addf %11, %13 : vector<8x128xf32>
    %15 = arith.negf %14 : vector<8x128xf32>
    %16 = math.exp %15 : vector<8x128xf32>
    %cst_11 = arith.constant 1.000000e+00 : f32
    %17 = vector.broadcast %cst_11 : f32 to vector<8x128xf32>
    %18 = arith.addf %17, %16 : vector<8x128xf32>
    %19 = arith.divf %17, %18 : vector<8x128xf32>
    %c0_12 = arith.constant 0 : index
    %c0_13 = arith.constant 0 : index
    %20 = vector.load %arg6[%c0_12, %c0_13] : memref<8x128xf32, #tpu.memory_space<vmem>>, vector<8x128xf32>
    tpu.vector_store %arg6[%c0_12, %c0_13], %19 {strides = array<i32>} : memref<8x128xf32, #tpu.memory_space<vmem>>, vector<8x128xf32>,
    return
  }
  func.func @transform_0(%arg0: i32) -> (i32, i32) {
    %c0_i32 = arith.constant 0 : i32
    %c0_i32_0 = arith.constant 0 : i32
    return %arg0, %c0_i32 : i32, i32
  }
  func.func @transform_1(%arg0: i32) -> (i32, i32) {
    %c0_i32 = arith.constant 0 : i32
    %c0_i32_0 = arith.constant 0 : i32
    %c0_i32_1 = arith.constant 0 : i32
    return %c0_i32, %c0_i32_0 : i32, i32
  }
  func.func @transform_2(%arg0: i32) -> (i32, i32) {
    %c0_i32 = arith.constant 0 : i32
    %c0_i32_0 = arith.constant 0 : i32
    %c0_i32_1 = arith.constant 0 : i32
    return %c0_i32, %c0_i32_0 : i32, i32
  }
  func.func @transform_3(%arg0: i32) -> (i32, i32) {
    %c0_i32 = arith.constant 0 : i32
    %c0_i32_0 = arith.constant 0 : i32
    %c0_i32_1 = arith.constant 0 : i32
    return %c0_i32, %c0_i32_0 : i32, i32
  }
  func.func @transform_4(%arg0: i32) -> (i32, i32) {
    %c0_i32 = arith.constant 0 : i32
    %c0_i32_0 = arith.constant 0 : i32
    %c0_i32_1 = arith.constant 0 : i32
    return %c0_i32, %c0_i32_0 : i32, i32
  }
  func.func @transform_5(%arg0: i32) -> (i32, i32) {
    %c0_i32 = arith.constant 0 : i32
    %c0_i32_0 = arith.constant 0 : i32
    return %arg0, %c0_i32 : i32, i32
  }
}

</mosaic_0001>

<bundles_post_ra>
// kernel: tpu_custom_call.1
= control target key start
LH: loop header
LB: loop body
LE: loop exit
PB: predicated region body
PF: predicated region fallthrough
CT: control target
= control target key end

     0   :  { %10 = vsyncpa [#allocation3], 0  ;;  %s471_s0 = inlined_call_operand.hbm [shape: f32[8,16], index: 0, kind: input, shape index: {}]   ;;  %s472_s1 = inlined_call_operand.hbm [shape: bf16[16,128], index: 1, kind: input, shape index: {}]   ;;  %s473_s2 = inlined_call_operand.vmem [shape: f32[1,128], index: 2, kind: input, shape index: {}]   ;;  %s474_s3 = inlined_call_operand.hbm [shape: bf16[128,128], index: 3, kind: input, shape index: {}]   ;;  %s475_s4 = inlined_call_operand.vmem [shape: f32[1,128], index: 4, kind: input, shape index: {}]   ;;  %s476_s5 = inlined_call_operand.hbm [shape: f32[8,128], index: 5, kind: output, shape index: {}]  }
   0x1   :  { %11 = vsyncpa [#allocation6], 0 }
   0x2   :  { %12 = vsyncpa [#allocation4], 0  ;;  %s415_s18 = smov [#allocation5]  }
   0x3   :  { %s28_s19 = sshll.u32 %s415_s18, 4  ;;  %s29_s19 = int_to_ptr.vmem [resolvable:$true] %s28_s19 }
   0x4   :  { %s337_s20 = scalar_lea.vmem %s29_s19, 128  ;;  %p342_p1 = scmp.lt.s32.totalorder %s29_s19, %s29_s19 }
   0x5   :  { %p338_p0 = scmp.ne.s32.totalorder %s29_s19, %s337_s20  ;;  %p343_p2 = scmp.lt.s32.totalorder %s337_s20, %s337_s20 }
   0x7   :  { %p344_p3 = por %p343_p2, %p342_p1 }
   0x9   :  { %p345_p4 = pnand %p344_p3, %p338_p0 }
   0xb   :  { %348 = shalt.err (!%p345_p4)
}
   0xc   :  { %s416_s21 = smov 64   ;;  %s417_s22 = smov 4  }
   0xd   :  { %34 = dma.hbm_to_vmem [thread:$0]  %s472_s1, 128, %s29_s19, [#allocation6], %s416_s21, %s416_s21, %s417_s22  }
   0xe   :  { %s418_s25 = smov [#allocation2]   ;;  %s419_s27 = smov [#allocation7]  }
   0xf   :  { %s19_s26 = sshll.u32 %s418_s25, 4  ;;  %s42_s28 = sshll.u32 %s419_s27, 4  ;;  %s20_s26 = int_to_ptr.vmem [resolvable:$true] %s19_s26  ;;  %s43_s28 = int_to_ptr.vmem [resolvable:$true] %s42_s28 }
  0x10   :  { %s357_s29 = scalar_lea.vmem %s20_s26, 128  ;;  %p362_p6 = scmp.lt.s32.totalorder %s20_s26, %s20_s26 }
  0x11   :  { %p358_p5 = scmp.ne.s32.totalorder %s20_s26, %s357_s29  ;;  %p363_p7 = scmp.lt.s32.totalorder %s357_s29, %s357_s29 }
  0x13   :  { %p364_p8 = por %p363_p7, %p362_p6 }
  0x15   :  { %p365_p9 = pnand %p364_p8, %p358_p5 }
  0x17   :  { %368 = shalt.err (!%p365_p9)
}
  0x18   :  { %22 = dma.hbm_to_vmem [thread:$0]  %s471_s0, 128, %s20_s26, [#allocation3]  }
  0x19   :  { %s377_s7 = scalar_lea.vmem %s43_s28, 1024  ;;  %p382_p11 = scmp.lt.s32.totalorder %s43_s28, %s43_s28 }
  0x1a   :  { %p378_p10 = scmp.ne.s32.totalorder %s43_s28, %s377_s7  ;;  %p383_p12 = scmp.lt.s32.totalorder %s377_s7, %s377_s7 }
  0x1c   :  { %p384_p13 = por %p383_p12, %p382_p11 }
  0x1e   :  { %p385_p0 = pnand %p384_p13, %p378_p10 }
  0x20   :  { %388 = shalt.err (!%p385_p0)
}
  0x21   :  { %48 = dma.hbm_to_vmem [thread:$0]  %s474_s3, 1024, %s43_s28, [#allocation6], %s416_s21, %s416_s21, %s417_s22  }
  0x22   :  { %409 = dma.done.wait [#allocation3], 128  }
  0x23   :  { %410 = vsyncadd [#allocation3], 4294967168 }
  0x24   :  { %411 = dma.done.wait [#allocation6], 1152  }
  0x25   :  { %412 = vsyncadd [#allocation6], 4294966144  ;;  %v420_v0 = vmov 0.0   ;;  %vm421_vm0 = vmmov 0   ;;  %v316_v1 = vld [vmem:[#allocation5] sm:$0xff]   ;;  %v61_v2 = vld [vmem:[#allocation2] sm:$0xff] }
  0x26   :  { %282 = vmatprep.subr.bf16.mxu0 %v420_v0  ;;  %284 = vmatprep.mubr.msk.bf16.mxu0 %vm421_vm0, %v420_v0  ;;  %v62_v3 = vpack.c.bf16 %v61_v2, %v61_v2  ;;  %vm78_vm1 = vcmask 130048   ;;  %v317_v4 = vld [vmem:[#allocation7 + $0x38] sm:$0xff]   ;;  %v318_v5 = vld [vmem:[#allocation7 + $0x30] sm:$0xff]   ;;  %v319_v6 = vld [vmem:[#allocation7 + $0x28] sm:$0xff]  }
  0x27   :  { %288 = vmatprep.subr.bf16.mxu1 %v420_v0  ;;  %304 = vmatprep.mubr.msk.bf16.mxu1 %vm421_vm0, %v420_v0  ;;  %v320_v7 = vld [vmem:[#allocation7 + $0x20] sm:$0xff]   ;;  %v321_v8 = vld [vmem:[#allocation7 + $0x18] sm:$0xff]   ;;  %v322_v9 = vld [vmem:[#allocation7 + $0x10] sm:$0xff]  }
  0x28   :  { %283 = vmatpush3.bf16.msra.mxu0 %v316_v1  ;;  %289 = vmatpush3.bf16.msra.mxu1 %v317_v4  ;;  %v323_v10 = vld [vmem:[#allocation7 + $0x8] sm:$0xff]   ;;  %v324_v11 = vld [vmem:[#allocation7] sm:$0xff]   ;;  %v258_v12 = vld [vmem:[%s473_s2] ss:$0 sm:$0xff]  ;;  %s422_s2 = smov [#allocation8]  }
  0x29   :  { %290 = vmatprep.subr.bf16.mxu1 %v420_v0  ;;  %v261_v20 = vld [vmem:[%s475_s4] ss:$0 sm:$0xff]  ;;  %s248_s11 = sshll.u32 %s422_s2, 4  ;;  %s249_s11 = int_to_ptr.vmem [resolvable:$true] %s248_s11 }
  0x2a   :  { %s389_s12 = scalar_lea.vmem %s249_s11, 128  ;;  %p394_p2 = scmp.lt.s32.totalorder %s249_s11, %s249_s11 }
  0x2b   :  { %285 = vmatmul.mubr.msk.bf16.vlgmr.msra.gmra.mxu0 %vm78_vm1, %v62_v3  ;;  %p390_p1 = scmp.ne.s32.totalorder %s249_s11, %s389_s12  ;;  %p395_p3 = scmp.lt.s32.totalorder %s389_s12, %s389_s12 }
  0x2c   :  { %291 = vmatpush3.bf16.msra.mxu1 %v318_v5 }
  0x2d   :  { %292 = vmatprep.subr.bf16.mxu1 %v420_v0  ;;  %p396_p4 = por %p395_p3, %p394_p2 }
  0x2f   :  { %p397_p5 = pnand %p396_p4, %p390_p1 }
  0x30   :  { %293 = vmatpush3.bf16.msra.mxu1 %v319_v6 }
  0x31   :  { %294 = vmatprep.subr.bf16.mxu1 %v420_v0 }
  0x34   :  { %295 = vmatpush3.bf16.msra.mxu1 %v320_v7 }
  0x35   :  { %296 = vmatprep.subr.bf16.mxu1 %v420_v0 }
  0x38   :  { %297 = vmatpush3.bf16.msra.mxu1 %v321_v8 }
  0x39   :  { %298 = vmatprep.subr.bf16.mxu1 %v420_v0 }
  0x3c   :  { %299 = vmatpush3.bf16.msra.mxu1 %v322_v9 }
  0x3d   :  { %300 = vmatprep.subr.bf16.mxu1 %v420_v0 }
  0x40   :  { %301 = vmatpush3.bf16.msra.mxu1 %v323_v10 }
  0x41   :  { %302 = vmatprep.subr.bf16.mxu1 %v420_v0 }
  0x44   :  { %303 = vmatpush3.bf16.msra.mxu1 %v324_v11 }
  0xeb   :  { %v116_v13 = vpop.f32.mrf.mxu0 }
  0xec   :  { %v117_v14 = vadd.f32 %v258_v12, %v116_v13 }
  0xed   :  { %v286_v15 = vpop.f32.mrf.mxu0 }
  0xee   :  { %v122_v16 = vmax.f32 %v117_v14, 0.0 }
  0xef   :  { %v119_v17 = vpop.f32.mrf.mxu0 }
  0xf0   :  { %v123_v18 = vpack.c.bf16 %v122_v16, %v122_v16 }
  0xf1   :  { %v287_v19 = vpop.f32.mrf.mxu0 }
  0xf2   :  { %305 = vmatmul.mubr.bf16.vlgmr.msra.gmra.mxu1 %v123_v18 }
 0x1b2   :  { %v229_v21 = vpop.f32.mrf.mxu1 }
 0x1b3   :  { %v230_v22 = vadd.f32 %v261_v20, %v229_v21 }
 0x1b4   :  { %v306_v23 = vpop.f32.mrf.mxu1 }
 0x1b5   :  { %v270_v24 = vmul.f32 -1.442695, %v230_v22 }
 0x1b6   :  { %v232_v25 = vpop.f32.mrf.mxu1 }
 0x1b7   :  { %325 = vpow2.f32 %v270_v24 }
 0x1b8   :  { %v307_v26 = vpop.f32.mrf.mxu1 }
 0x1c4   :  { %v326_v27 = vpop.eup %325 }
 0x1c5   :  { %v238_v28 = vadd.f32 1.0, %v326_v27 }
 0x1c7   :  { %327 = vrcp.f32 %v238_v28 }
 0x1d4   :  { %v328_v29 = vpop.eup %327 }
 0x1d5   :  { %241 = vst [vmem:[#allocation8] sm:$0xff] %v328_v29 }
 0x1d6   :  { %400 = shalt.err (!%p397_p5)
}
 0x1d7   :  { %251 = dma.vmem_to_hbm [thread:$0]  %s249_s11, 128, %s476_s5, [#allocation4]  }
 0x1d8   :  { %413 = dma.done.wait [#allocation4], 128  }
 0x1d9   :  { %414 = vsyncadd [#allocation4], 4294967168 }
 0x1da   :  { %255 = vsyncpa [#allocation3], 1 }
 0x1db   :  { %256 = vsyncpa [#allocation6], 1 }
 0x1dc   :  { %257 = vsyncpa [#allocation4], 1 }

</bundles_post_ra>
